<compile_context>
chip_gen: v6e
topology: v6e:2x2x1
jax: 0.10.0
libtpu: 0.0.40
codegen_flags: <defaults>
</compile_context>

<pallas_src>
import jax
import jax.numpy as jnp
from jax import lax
from jax.experimental import pallas as pl
from jax.experimental.pallas import tpu as pltpu

BN_EPS = 1e-5


# ---------------- fused Pallas kernel ----------------

def _make_fused_kernel(num_layers, batch):
    """Build the fused forward kernel for a static layer count / batch size."""

    def kernel(*refs):
        x1_ref, x2_ref = refs[0], refs[1]
        layer_refs = refs[2:2 + 4 * num_layers]
        wh_ref = refs[2 + 4 * num_layers]
        bh_ref = refs[3 + 4 * num_layers]
        o_ref = refs[4 + 4 * num_layers]

        # Stack both branches once (sublane-tile aligned for batch % 8 == 0).
        x = jnp.concatenate([x1_ref[...], x2_ref[...]], axis=0)     # (2B, Din0)

        # Row mask selecting branch-1 rows; hoisted out of the layer loop.
        row = lax.broadcasted_iota(jnp.int32, (2 * batch, 1), 0)
        is_b1 = row < batch                                          # (2B, 1) bool

        for l in range(num_layers):
            wt_ref, b_ref, g_ref, be_ref = layer_refs[4 * l:4 * l + 4]

            # One shared MXU matmul for both branches: (2B, Din) @ (Din, Dout).
            z = jnp.dot(x, wt_ref[...], preferred_element_type=jnp.float32) + b_ref[...]
            h = jnp.maximum(z, 0.0)                                  # ReLU

            gamma = g_ref[...]
            beta = be_ref[...]

            def bn_scale_shift(hh):
                # PyTorch BatchNorm1d training mode: per-feature batch mean,
                # biased variance, eps=1e-5. Fold affine into scale/shift so
                # the big tensor only sees one fused multiply-add.
                m = jnp.mean(hh, axis=0, keepdims=True)
                d = hh - m
                v = jnp.mean(d * d, axis=0, keepdims=True)
                scale = gamma * lax.rsqrt(v + BN_EPS)
                shift = beta - m * scale
                return scale, shift

            # BN statistics MUST be per branch half (rows [:B] vs [B:]).
            s1, t1 = bn_scale_shift(h[:batch])
            s2, t2 = bn_scale_shift(h[batch:])

            # Merge per-half (1, Dout) params with a broadcast select, then
            # apply in one pass over the stacked activations (no concat).
            scale = jnp.where(is_b1, s1, s2)                         # (2B, Dout)
            shift = jnp.where(is_b1, t1, t2)
            x = h * scale + shift

        # Head: (x1 - x2)**2 @ Wh.T + bh, done on the VPU (mul + lane reduce),
        # avoiding a wasteful length-2 MXU contraction.
        diff = x[:batch] - x[batch:]                                 # (B, 2)
        sq = diff * diff
        o_ref[...] = jnp.sum(sq * wh_ref[...], axis=-1, keepdims=True) + bh_ref[...]

    return kernel


# ---------------- wrapper ----------------

def siam_forward(A, B, params, head_params):
    """Matches SiamModel.forward: head((net_(A[1]) - net_(B[1]))**2)."""
    x1, x2 = A[1], B[1]
    batch = x1.shape[0]
    num_layers = len(params)

    flat = [x1.astype(jnp.float32), x2.astype(jnp.float32)]
    for (w, b, g, be) in params:
        flat += [w.T, b, g, be]          # pre-transpose (Dout, Din) -> (Din, Dout)
    wh, bh = head_params
    flat += [wh, bh]

    vmem = pl.BlockSpec(memory_space=pltpu.MemorySpace.VMEM)
    return pl.pallas_call(
        _make_fused_kernel(num_layers, batch),
        out_shape=jax.ShapeDtypeStruct((batch, 1), jnp.float32),
        in_specs=[vmem] * len(flat),
        out_specs=vmem,
    )(*flat)


# ---------------- parameter init (PyTorch-style shapes) ----------------

def init_params(key, lyrwds):
    """Deterministic synthetic init mirroring the module's parameter shapes."""
    params = []
    for i in range(len(lyrwds) - 1):
        din, dout = lyrwds[i], lyrwds[i + 1]
        key, kw, kb = jax.random.split(key, 3)
        bound = 1.0 / (din ** 0.5)
        w = jax.random.uniform(kw, (dout, din), jnp.float32, -bound, bound)
        b = jax.random.uniform(kb, (1, dout), jnp.float32, -bound, bound)
        gamma = jnp.ones((1, dout), jnp.float32)   # BatchNorm1d weight
        beta = jnp.zeros((1, dout), jnp.float32)   # BatchNorm1d bias
        params.append((w, b, gamma, beta))
    key, kw, kb = jax.random.split(key, 3)
    bound = 1.0 / (2 ** 0.5)
    wh = jax.random.uniform(kw, (1, 2), jnp.float32, -bound, bound)   # head: Linear(2, 1)
    bh = jax.random.uniform(kb, (1, 1), jnp.float32, -bound, bound)
    return params, (wh, bh)


# ---------------- pure-JAX reference for verification ----------------

def _ref_forward(A, B, params, head_params):
    def net(x):
        for (w, b, g, be) in params:
            z = x @ w.T + b
            h = jnp.maximum(z, 0.0)
            m = jnp.mean(h, axis=0, keepdims=True)
            v = jnp.mean((h - m) ** 2, axis=0, keepdims=True)
            x = (h - m) / jnp.sqrt(v + BN_EPS) * g + be
        return x
    x1, x2 = net(A[1]), net(B[1])
    wh, bh = head_params
    return ((x1 - x2) ** 2) @ wh.T + bh


if __name__ == "__main__":
    lyrwds = [16, 32, 2]   # last width must be 2 to feed head = Linear(2, 1)
    batch = 8

    key = jax.random.PRNGKey(0)
    kA, kB, kp = jax.random.split(key, 3)

    # A and B are (label, features) pairs; forward consumes index [1]
    A = (jnp.zeros((batch,), jnp.int32),
         jax.random.normal(kA, (batch, lyrwds[0]), jnp.float32))
    B = (jnp.zeros((batch,), jnp.int32),
         jax.random.normal(kB, (batch, lyrwds[0]), jnp.float32))

    params, head_params = init_params(kp, lyrwds)

    out = siam_forward(A, B, params, head_params)
    jax.block_until_ready(out)

    ref = _ref_forward(A, B, params, head_params)
    assert out.shape == (batch, 1)
    assert jnp.allclose(out, ref, atol=1e-4, rtol=1e-4)

    print("KERNEL_OK")
</pallas_src>

<mosaic_0001>
module attributes {stable_mosaic.version = 11 : i64} {
  func.func @kernel(%arg0: memref<8x16xf32, #tpu.memory_space<vmem>>, %arg1: memref<8x16xf32, #tpu.memory_space<vmem>>, %arg2: memref<16x32xf32, #tpu.memory_space<vmem>>, %arg3: memref<1x32xf32, #tpu.memory_space<vmem>>, %arg4: memref<1x32xf32, #tpu.memory_space<vmem>>, %arg5: memref<1x32xf32, #tpu.memory_space<vmem>>, %arg6: memref<32x2xf32, #tpu.memory_space<vmem>>, %arg7: memref<1x2xf32, #tpu.memory_space<vmem>>, %arg8: memref<1x2xf32, #tpu.memory_space<vmem>>, %arg9: memref<1x2xf32, #tpu.memory_space<vmem>>, %arg10: memref<1x2xf32, #tpu.memory_space<vmem>>, %arg11: memref<1x1xf32, #tpu.memory_space<vmem>>, %arg12: memref<8x1xf32, #tpu.memory_space<vmem>>) attributes {dimension_semantics = [], scalar_prefetch = 0 : i64, scratch_operands = 0 : i64, tpu.core_type = #tpu.core_type<tc>} {
    %c0 = arith.constant 0 : index
    %c0_0 = arith.constant 0 : index
    %0 = vector.load %arg0[%c0, %c0_0] : memref<8x16xf32, #tpu.memory_space<vmem>>, vector<8x16xf32>
    %c0_1 = arith.constant 0 : index
    %c0_2 = arith.constant 0 : index
    %1 = vector.load %arg1[%c0_1, %c0_2] : memref<8x16xf32, #tpu.memory_space<vmem>>, vector<8x16xf32>
    %2 = tpu.concatenate %0, %1 in 0 : vector<8x16xf32>, vector<8x16xf32> -> vector<16x16xf32>
    %3 = tpu.iota {dimensions = array<i32: 0>} : vector<16x1xi32>
    %c8_i32 = arith.constant 8 : i32
    %4 = vector.broadcast %c8_i32 : i32 to vector<16x1xi32>
    %5 = arith.cmpi slt, %3, %4 : vector<16x1xi32>
    %c0_3 = arith.constant 0 : index
    %c0_4 = arith.constant 0 : index
    %6 = vector.load %arg2[%c0_3, %c0_4] : memref<16x32xf32, #tpu.memory_space<vmem>>, vector<16x32xf32>
    %cst = arith.constant dense<0.000000e+00> : vector<16x32xf32>
    %7 = tpu.matmul %2, %6, %cst {dimension_numbers = #tpu.dot_dimension_numbers<[1], [0], [0], [1], [0, 0, 1, 1], [], []>} : vector<16x16xf32>, vector<16x32xf32>, vector<16x32xf32> -> vector<16x32xf32>
    %c0_5 = arith.constant 0 : index
    %c0_6 = arith.constant 0 : index
    %8 = vector.load %arg3[%c0_5, %c0_6] : memref<1x32xf32, #tpu.memory_space<vmem>>, vector<1x32xf32>
    %9 = vector.broadcast %8 : vector<1x32xf32> to vector<16x32xf32>
    %10 = arith.addf %7, %9 : vector<16x32xf32>
    %cst_7 = arith.constant 0.000000e+00 : f32
    %11 = vector.broadcast %cst_7 : f32 to vector<16x32xf32>
    %12 = arith.maximumf %10, %11 : vector<16x32xf32>
    %c0_8 = arith.constant 0 : index
    %c0_9 = arith.constant 0 : index
    %13 = vector.load %arg4[%c0_8, %c0_9] : memref<1x32xf32, #tpu.memory_space<vmem>>, vector<1x32xf32>
    %c0_10 = arith.constant 0 : index
    %c0_11 = arith.constant 0 : index
    %14 = vector.load %arg5[%c0_10, %c0_11] : memref<1x32xf32, #tpu.memory_space<vmem>>, vector<1x32xf32>
    %15 = vector.extract_strided_slice %12 {offsets = [0, 0], sizes = [8, 32], strides = [1, 1]} : vector<16x32xf32> to vector<8x32xf32>
    %cst_12 = arith.constant dense<0.000000e+00> : vector<32xf32>
    %16 = vector.multi_reduction <add>, %15, %cst_12 [0] : vector<8x32xf32> to vector<32xf32>
    %17 = vector.shape_cast %16 : vector<32xf32> to vector<1x32xf32>
    %cst_13 = arith.constant 8.000000e+00 : f32
    %18 = vector.broadcast %cst_13 : f32 to vector<1x32xf32>
    %19 = arith.divf %17, %18 : vector<1x32xf32>
    %20 = vector.broadcast %19 : vector<1x32xf32> to vector<8x32xf32>
    %21 = arith.subf %15, %20 : vector<8x32xf32>
    %22 = arith.mulf %21, %21 : vector<8x32xf32>
    %cst_14 = arith.constant dense<0.000000e+00> : vector<32xf32>
    %23 = vector.multi_reduction <add>, %22, %cst_14 [0] : vector<8x32xf32> to vector<32xf32>
    %24 = vector.shape_cast %23 : vector<32xf32> to vector<1x32xf32>
    %cst_15 = arith.constant 8.000000e+00 : f32
    %25 = vector.broadcast %cst_15 : f32 to vector<1x32xf32>
    %26 = arith.divf %24, %25 : vector<1x32xf32>
    %cst_16 = arith.constant 9.99999974E-6 : f32
    %27 = vector.broadcast %cst_16 : f32 to vector<1x32xf32>
    %28 = arith.addf %26, %27 : vector<1x32xf32>
    %29 = math.rsqrt %28 : vector<1x32xf32>
    %30 = arith.mulf %13, %29 : vector<1x32xf32>
    %31 = arith.mulf %19, %30 : vector<1x32xf32>
    %32 = arith.subf %14, %31 : vector<1x32xf32>
    %33 = vector.extract_strided_slice %12 {offsets = [8, 0], sizes = [8, 32], strides = [1, 1]} : vector<16x32xf32> to vector<8x32xf32>
    %cst_17 = arith.constant dense<0.000000e+00> : vector<32xf32>
    %34 = vector.multi_reduction <add>, %33, %cst_17 [0] : vector<8x32xf32> to vector<32xf32>
    %35 = vector.shape_cast %34 : vector<32xf32> to vector<1x32xf32>
    %cst_18 = arith.constant 8.000000e+00 : f32
    %36 = vector.broadcast %cst_18 : f32 to vector<1x32xf32>
    %37 = arith.divf %35, %36 : vector<1x32xf32>
    %38 = vector.broadcast %37 : vector<1x32xf32> to vector<8x32xf32>
    %39 = arith.subf %33, %38 : vector<8x32xf32>
    %40 = arith.mulf %39, %39 : vector<8x32xf32>
    %cst_19 = arith.constant dense<0.000000e+00> : vector<32xf32>
    %41 = vector.multi_reduction <add>, %40, %cst_19 [0] : vector<8x32xf32> to vector<32xf32>
    %42 = vector.shape_cast %41 : vector<32xf32> to vector<1x32xf32>
    %cst_20 = arith.constant 8.000000e+00 : f32
    %43 = vector.broadcast %cst_20 : f32 to vector<1x32xf32>
    %44 = arith.divf %42, %43 : vector<1x32xf32>
    %cst_21 = arith.constant 9.99999974E-6 : f32
    %45 = vector.broadcast %cst_21 : f32 to vector<1x32xf32>
    %46 = arith.addf %44, %45 : vector<1x32xf32>
    %47 = math.rsqrt %46 : vector<1x32xf32>
    %48 = arith.mulf %13, %47 : vector<1x32xf32>
    %49 = arith.mulf %37, %48 : vector<1x32xf32>
    %50 = arith.subf %14, %49 : vector<1x32xf32>
    %51 = vector.shape_cast %5 : vector<16x1xi1> to vector<16x1xi1>
    %52 = vector.broadcast %51 : vector<16x1xi1> to vector<16x32xi1>
    %53 = vector.shape_cast %30 : vector<1x32xf32> to vector<1x32xf32>
    %54 = vector.broadcast %53 : vector<1x32xf32> to vector<16x32xf32>
    %55 = vector.shape_cast %48 : vector<1x32xf32> to vector<1x32xf32>
    %56 = vector.broadcast %55 : vector<1x32xf32> to vector<16x32xf32>
    %57 = arith.select %52, %54, %56 : vector<16x32xi1>, vector<16x32xf32>
    %58 = vector.shape_cast %5 : vector<16x1xi1> to vector<16x1xi1>
    %59 = vector.broadcast %58 : vector<16x1xi1> to vector<16x32xi1>
    %60 = vector.shape_cast %32 : vector<1x32xf32> to vector<1x32xf32>
    %61 = vector.broadcast %60 : vector<1x32xf32> to vector<16x32xf32>
    %62 = vector.shape_cast %50 : vector<1x32xf32> to vector<1x32xf32>
    %63 = vector.broadcast %62 : vector<1x32xf32> to vector<16x32xf32>
    %64 = arith.select %59, %61, %63 : vector<16x32xi1>, vector<16x32xf32>
    %65 = arith.mulf %12, %57 : vector<16x32xf32>
    %66 = arith.addf %65, %64 : vector<16x32xf32>
    %c0_22 = arith.constant 0 : index
    %c0_23 = arith.constant 0 : index
    %67 = vector.load %arg6[%c0_22, %c0_23] : memref<32x2xf32, #tpu.memory_space<vmem>>, vector<32x2xf32>
    %cst_24 = arith.constant dense<0.000000e+00> : vector<16x2xf32>
    %68 = tpu.matmul %66, %67, %cst_24 {dimension_numbers = #tpu.dot_dimension_numbers<[1], [0], [0], [1], [0, 0, 1, 1], [], []>} : vector<16x32xf32>, vector<32x2xf32>, vector<16x2xf32> -> vector<16x2xf32>
    %c0_25 = arith.constant 0 : index
    %c0_26 = arith.constant 0 : index
    %69 = vector.load %arg7[%c0_25, %c0_26] : memref<1x2xf32, #tpu.memory_space<vmem>>, vector<1x2xf32>
    %70 = vector.broadcast %69 : vector<1x2xf32> to vector<16x2xf32>
    %71 = arith.addf %68, %70 : vector<16x2xf32>
    %cst_27 = arith.constant 0.000000e+00 : f32
    %72 = vector.broadcast %cst_27 : f32 to vector<16x2xf32>
    %73 = arith.maximumf %71, %72 : vector<16x2xf32>
    %c0_28 = arith.constant 0 : index
    %c0_29 = arith.constant 0 : index
    %74 = vector.load %arg8[%c0_28, %c0_29] : memref<1x2xf32, #tpu.memory_space<vmem>>, vector<1x2xf32>
    %c0_30 = arith.constant 0 : index
    %c0_31 = arith.constant 0 : index
    %75 = vector.load %arg9[%c0_30, %c0_31] : memref<1x2xf32, #tpu.memory_space<vmem>>, vector<1x2xf32>
    %76 = vector.extract_strided_slice %73 {offsets = [0, 0], sizes = [8, 2], strides = [1, 1]} : vector<16x2xf32> to vector<8x2xf32>
    %cst_32 = arith.constant dense<0.000000e+00> : vector<2xf32>
    %77 = vector.multi_reduction <add>, %76, %cst_32 [0] : vector<8x2xf32> to vector<2xf32>
    %78 = vector.shape_cast %77 : vector<2xf32> to vector<1x2xf32>
    %cst_33 = arith.constant 8.000000e+00 : f32
    %79 = vector.broadcast %cst_33 : f32 to vector<1x2xf32>
    %80 = arith.divf %78, %79 : vector<1x2xf32>
    %81 = vector.broadcast %80 : vector<1x2xf32> to vector<8x2xf32>
    %82 = arith.subf %76, %81 : vector<8x2xf32>
    %83 = arith.mulf %82, %82 : vector<8x2xf32>
    %cst_34 = arith.constant dense<0.000000e+00> : vector<2xf32>
    %84 = vector.multi_reduction <add>, %83, %cst_34 [0] : vector<8x2xf32> to vector<2xf32>
    %85 = vector.shape_cast %84 : vector<2xf32> to vector<1x2xf32>
    %cst_35 = arith.constant 8.000000e+00 : f32
    %86 = vector.broadcast %cst_35 : f32 to vector<1x2xf32>
    %87 = arith.divf %85, %86 : vector<1x2xf32>
    %cst_36 = arith.constant 9.99999974E-6 : f32
    %88 = vector.broadcast %cst_36 : f32 to vector<1x2xf32>
    %89 = arith.addf %87, %88 : vector<1x2xf32>
    %90 = math.rsqrt %89 : vector<1x2xf32>
    %91 = arith.mulf %74, %90 : vector<1x2xf32>
    %92 = arith.mulf %80, %91 : vector<1x2xf32>
    %93 = arith.subf %75, %92 : vector<1x2xf32>
    %94 = vector.extract_strided_slice %73 {offsets = [8, 0], sizes = [8, 2], strides = [1, 1]} : vector<16x2xf32> to vector<8x2xf32>
    %cst_37 = arith.constant dense<0.000000e+00> : vector<2xf32>
    %95 = vector.multi_reduction <add>, %94, %cst_37 [0] : vector<8x2xf32> to vector<2xf32>
    %96 = vector.shape_cast %95 : vector<2xf32> to vector<1x2xf32>
    %cst_38 = arith.constant 8.000000e+00 : f32
    %97 = vector.broadcast %cst_38 : f32 to vector<1x2xf32>
    %98 = arith.divf %96, %97 : vector<1x2xf32>
    %99 = vector.broadcast %98 : vector<1x2xf32> to vector<8x2xf32>
    %100 = arith.subf %94, %99 : vector<8x2xf32>
    %101 = arith.mulf %100, %100 : vector<8x2xf32>
    %cst_39 = arith.constant dense<0.000000e+00> : vector<2xf32>
    %102 = vector.multi_reduction <add>, %101, %cst_39 [0] : vector<8x2xf32> to vector<2xf32>
    %103 = vector.shape_cast %102 : vector<2xf32> to vector<1x2xf32>
    %cst_40 = arith.constant 8.000000e+00 : f32
    %104 = vector.broadcast %cst_40 : f32 to vector<1x2xf32>
    %105 = arith.divf %103, %104 : vector<1x2xf32>
    %cst_41 = arith.constant 9.99999974E-6 : f32
    %106 = vector.broadcast %cst_41 : f32 to vector<1x2xf32>
    %107 = arith.addf %105, %106 : vector<1x2xf32>
    %108 = math.rsqrt %107 : vector<1x2xf32>
    %109 = arith.mulf %74, %108 : vector<1x2xf32>
    %110 = arith.mulf %98, %109 : vector<1x2xf32>
    %111 = arith.subf %75, %110 : vector<1x2xf32>
    %112 = vector.shape_cast %5 : vector<16x1xi1> to vector<16x1xi1>
    %113 = vector.broadcast %112 : vector<16x1xi1> to vector<16x2xi1>
    %114 = vector.shape_cast %91 : vector<1x2xf32> to vector<1x2xf32>
    %115 = vector.broadcast %114 : vector<1x2xf32> to vector<16x2xf32>
    %116 = vector.shape_cast %109 : vector<1x2xf32> to vector<1x2xf32>
    %117 = vector.broadcast %116 : vector<1x2xf32> to vector<16x2xf32>
    %118 = arith.select %113, %115, %117 : vector<16x2xi1>, vector<16x2xf32>
    %119 = vector.shape_cast %5 : vector<16x1xi1> to vector<16x1xi1>
    %120 = vector.broadcast %119 : vector<16x1xi1> to vector<16x2xi1>
    %121 = vector.shape_cast %93 : vector<1x2xf32> to vector<1x2xf32>
    %122 = vector.broadcast %121 : vector<1x2xf32> to vector<16x2xf32>
    %123 = vector.shape_cast %111 : vector<1x2xf32> to vector<1x2xf32>
    %124 = vector.broadcast %123 : vector<1x2xf32> to vector<16x2xf32>
    %125 = arith.select %120, %122, %124 : vector<16x2xi1>, vector<16x2xf32>
    %126 = arith.mulf %73, %118 : vector<16x2xf32>
    %127 = arith.addf %126, %125 : vector<16x2xf32>
    %128 = vector.extract_strided_slice %127 {offsets = [0, 0], sizes = [8, 2], strides = [1, 1]} : vector<16x2xf32> to vector<8x2xf32>
    %129 = vector.extract_strided_slice %127 {offsets = [8, 0], sizes = [8, 2], strides = [1, 1]} : vector<16x2xf32> to vector<8x2xf32>
    %130 = arith.subf %128, %129 : vector<8x2xf32>
    %131 = arith.mulf %130, %130 : vector<8x2xf32>
    %c0_42 = arith.constant 0 : index
    %c0_43 = arith.constant 0 : index
    %132 = vector.load %arg10[%c0_42, %c0_43] : memref<1x2xf32, #tpu.memory_space<vmem>>, vector<1x2xf32>
    %133 = vector.broadcast %132 : vector<1x2xf32> to vector<8x2xf32>
    %134 = arith.mulf %131, %133 : vector<8x2xf32>
    %cst_44 = arith.constant dense<0.000000e+00> : vector<8xf32>
    %135 = vector.multi_reduction <add>, %134, %cst_44 [1] : vector<8x2xf32> to vector<8xf32>
    %136 = vector.shape_cast %135 : vector<8xf32> to vector<8x1xf32>
    %c0_45 = arith.constant 0 : index
    %c0_46 = arith.constant 0 : index
    %137 = vector.load %arg11[%c0_45, %c0_46] : memref<1x1xf32, #tpu.memory_space<vmem>>, vector<1x1xf32>
    %138 = vector.broadcast %137 : vector<1x1xf32> to vector<8x1xf32>
    %139 = arith.addf %136, %138 : vector<8x1xf32>
    %c0_47 = arith.constant 0 : index
    %c0_48 = arith.constant 0 : index
    %140 = vector.load %arg12[%c0_47, %c0_48] : memref<8x1xf32, #tpu.memory_space<vmem>>, vector<8x1xf32>
    tpu.vector_store %arg12[%c0_47, %c0_48], %139 {strides = array<i32>} : memref<8x1xf32, #tpu.memory_space<vmem>>, vector<8x1xf32>,
    return
  }
}

</mosaic_0001>

<bundles_post_ra>
// kernel: tpu_custom_call.1
= control target key start
LH: loop header
LB: loop body
LE: loop exit
PB: predicated region body
PF: predicated region fallthrough
CT: control target
= control target key end

     0   :  { %vm59_vm0 = vcmask 130048   ;;  %vm145_vm1 = vcmask 261120   ;;  %v198_v53 = vlaneseq  ;;  %vm325_vm2 = vcmask 15360   ;;  %s617_s2 = inlined_call_operand.vmem [shape: f32[16,32], index: 2, kind: input, shape index: {}]   ;;  %s618_s0 = inlined_call_operand.vmem [shape: f32[8,16], index: 0, kind: input, shape index: {}]   ;;  %s619_s1 = inlined_call_operand.vmem [shape: f32[8,16], index: 1, kind: input, shape index: {}]   ;;  %s620_s6 = inlined_call_operand.vmem [shape: f32[32,2], index: 6, kind: input, shape index: {}]   ;;  %s621_s3 = inlined_call_operand.vmem [shape: f32[1,32], index: 3, kind: input, shape index: {}]   ;;  %s622_s4 = inlined_call_operand.vmem [shape: f32[1,32], index: 4, kind: input, shape index: {}]   ;;  %s623_s5 = inlined_call_operand.vmem [shape: f32[1,32], index: 5, kind: input, shape index: {}]   ;;  %s624_s11 = inlined_call_operand.<no memory space> [shape: f32[1,1], index: 11, kind: input, shape index: {}]   ;;  %s625_s7 = inlined_call_operand.vmem [shape: f32[1,2], index: 7, kind: input, shape index: {}]   ;;  %s626_s8 = inlined_call_operand.vmem [shape: f32[1,2], index: 8, kind: input, shape index: {}]   ;;  %s627_s9 = inlined_call_operand.vmem [shape: f32[1,2], index: 9, kind: input, shape index: {}]   ;;  %s628_s10 = inlined_call_operand.vmem [shape: f32[1,2], index: 10, kind: input, shape index: {}]   ;;  %s629_s12 = inlined_call_operand.vmem [shape: f32[8,1], index: 12, kind: output, shape index: {}]  }
   0x1   :  { %v51_v0 = vld [vmem:[%s617_s2 + $0x8] sm:$0xff]  ;;  %v50_v1 = vld [vmem:[%s617_s2] sm:$0xff]  ;;  %v232_v4 = vld [vmem:[%s620_s6 + $0x18] sm:$0xff]  ;;  %vm425_vm3 = vcmask 7168  }
   0x2   :  { %v43_v2 = vld [vmem:[%s618_s0] sm:$0xff]  ;;  %449 = vmatprep.subr.mxu0 %v51_v0  ;;  %v231_v5 = vld [vmem:[%s620_s6 + $0x10] sm:$0xff]  ;;  %456 = vmatprep.subr.mxu1 %v232_v4  ;;  %v230_v6 = vld [vmem:[%s620_s6 + $0x8] sm:$0xff]  ;;  %v199_v55 = vshrl.u32 %v198_v53, 7 }
   0x3   :  { %453 = vmatprep.mubr.msk.f32.mxu0 %vm59_vm0, %v43_v2  ;;  %450 = vmatpush3.msra.mxu0 %v51_v0  ;;  %v44_v3 = vld [vmem:[%s619_s1] sm:$0xff] }
   0x4   :  { %451 = vmatprep.subr.mxu0 %v50_v1  ;;  %457 = vmatpush3.msra.mxu1 %v232_v4  ;;  %v229_v7 = vld [vmem:[%s620_s6] sm:$0xff]  ;;  %v578_v59 = vsub.s32 0, %v199_v55 }
   0x5   :  { %452 = vmatpush3.msra.mxu0 %v50_v1  ;;  %458 = vmatprep.subr.mxu1 %v231_v5  ;;  %v431_v8 = vld [vmem:[%s621_s3] ss:$0 sm:$0xff] }
   0x6   :  { %454 = vmatmul.mubr.msk.f32.vlgmr.msra.gmra.mxu0 %vm59_vm0, %v44_v3  ;;  %459 = vmatpush3.msra.mxu1 %v231_v5  ;;  %v143_v54 = vld [vmem:[%s622_s4] sm:$0x1] }
   0x7   :  { %460 = vmatprep.subr.mxu1 %v230_v6  ;;  %v144_v60 = vld [vmem:[%s623_s5] sm:$0x1] }
   0x8   :  { %461 = vmatpush3.msra.mxu1 %v230_v6 }
   0x9   :  { %462 = vmatprep.subr.mxu1 %v229_v7 }
   0xa   :  { %463 = vmatpush3.msra.mxu1 %v229_v7 }
  0xc6   :  { %v455_v9 = vpop.f32.mrf.mxu0 }
  0xc7   :  { %v138_v10 = vadd.f32 %v455_v9, %v431_v8 }
  0xc8   :  { %v132_v11 = vpop.f32.mrf.mxu0 }
  0xc9   :  { %v567_v12 = vmax.f32 %v138_v10, 0.0  ;;  %v133_v13 = vadd.f32 %v431_v8, %v132_v11  ;;  %v17_v10 = vstv %s624_s11  ;;  %v434_v11 = vld [vmem:[%s625_s7] ss:$0 sm:$0xff] }
  0xca   :  { %18 = vst [vmem:[#allocation2] sm:$0x1] %v17_v10 }
  0xcb   :  { %v170_v14 = vsel %vm145_vm1, %v567_v12, 0.0  ;;  %v141_v15 = vmax.f32 %v133_v13, 0.0 }
  0xcc   :  { %v171_v16 = vrot.slane %v170_v14, 4 }
  0xcd   :  { %v146_v17 = vsel %vm145_vm1, %v141_v15, 0.0 }
  0xce   :  { %v172_v18 = vadd.f32 %v171_v16, %v170_v14  ;;  %v147_v19 = vrot.slane %v146_v17, 4 }
  0xd0   :  { %v173_v20 = vrot.slane %v172_v18, 2  ;;  %v148_v21 = vadd.f32 %v147_v19, %v146_v17 }
  0xd2   :  { %v174_v22 = vadd.f32 %v173_v20, %v172_v18  ;;  %v149_v23 = vrot.slane %v148_v21, 2 }
  0xd4   :  { %v175_v24 = vrot.slane %v174_v22, 1  ;;  %v150_v25 = vadd.f32 %v149_v23, %v148_v21 }
  0xd6   :  { %v176_v26 = vadd.f32 %v175_v24, %v174_v22  ;;  %v151_v27 = vrot.slane %v150_v25, 1 }
  0xd8   :  { %v177_v28 = vmul.f32 0.125, %v176_v26  ;;  %v152_v29 = vadd.f32 %v151_v27, %v150_v25 }
  0xda   :  { %v178_v30 = vsub.f32 %v567_v12, %v177_v28  ;;  %v154_v31 = vmul.f32 0.125, %v152_v29 }
  0xdc   :  { %v179_v32 = vmul.f32 %v178_v30, %v178_v30  ;;  %v155_v33 = vsub.f32 %v141_v15, %v154_v31 }
  0xde   :  { %v180_v34 = vsel %vm145_vm1, %v179_v32, 0.0  ;;  %v156_v35 = vmul.f32 %v155_v33, %v155_v33 }
  0xdf   :  { %v181_v36 = vrot.slane %v180_v34, 4 }
  0xe0   :  { %v157_v37 = vsel %vm145_vm1, %v156_v35, 0.0 }
  0xe1   :  { %v182_v38 = vadd.f32 %v181_v36, %v180_v34  ;;  %v158_v39 = vrot.slane %v157_v37, 4 }
  0xe3   :  { %v183_v40 = vrot.slane %v182_v38, 2  ;;  %v159_v41 = vadd.f32 %v158_v39, %v157_v37 }
  0xe5   :  { %v184_v42 = vadd.f32 %v183_v40, %v182_v38  ;;  %v160_v43 = vrot.slane %v159_v41, 2 }
  0xe7   :  { %v185_v44 = vrot.slane %v184_v42, 1  ;;  %v161_v45 = vadd.f32 %v160_v43, %v159_v41 }
  0xe9   :  { %v186_v46 = vadd.f32 %v185_v44, %v184_v42  ;;  %v162_v47 = vrot.slane %v161_v45, 1 }
  0xeb   :  { %v187_v48 = vmul.f32 0.125, %v186_v46  ;;  %v163_v49 = vadd.f32 %v162_v47, %v161_v45 }
  0xed   :  { %v188_v50 = vadd.f32 1e-05, %v187_v48  ;;  %v164_v51 = vmul.f32 0.125, %v163_v49 }
  0xef   :  { %467 = vrsqrt.f32 %v188_v50  ;;  %v165_v52 = vadd.f32 1e-05, %v164_v51 }
  0xf1   :  { %469 = vrsqrt.f32 %v165_v52 }
  0xfc   :  { %v468_v56 = vpop.eup %467 }
  0xfd   :  { %v190_v57 = vmul.f32 %v468_v56, %v143_v54  ;;  %v323_v56 = vld [vmem:[%s626_s8] sm:$0x1] }
  0xfe   :  { %v470_v58 = vpop.eup %469 }
  0xff   :  { %v167_v61 = vmul.f32 %v470_v58, %v143_v54  ;;  %v191_v62 = vmul.f32 %v190_v57, %v177_v28  ;;  %v207_v2 = vrot.slane %v190_v57, %v578_v59 }
 0x101   :  { %v168_v63 = vmul.f32 %v167_v61, %v154_v31  ;;  %v192_v0 = vsub.f32 %v144_v60, %v191_v62  ;;  %v201_v1 = vrot.slane %v167_v61, %v578_v59  ;;  %v226_v7 = vmul.f32 %v207_v2, %v567_v12  ;;  %v324_v61 = vld [vmem:[%s627_s9] sm:$0x1] }
 0x103   :  { %v169_v3 = vsub.f32 %v144_v60, %v168_v63  ;;  %v221_v4 = vrot.slane %v192_v0, %v578_v59  ;;  %v225_v6 = vmul.f32 %v201_v1, %v141_v15 }
 0x105   :  { %v215_v5 = vrot.slane %v169_v3, %v578_v59  ;;  %v228_v9 = vadd.f32 %v226_v7, %v221_v4 }
 0x107   :  { %v227_v8 = vadd.f32 %v225_v6, %v215_v5 }
 0x109   :  { %464 = vmatprep.mubr.msk.f32.mxu1 %vm145_vm1, %v227_v8 }
 0x10a   :  { %465 = vmatmul.mubr.msk.f32.vlgmr.msra.gmra.mxu1 %vm145_vm1, %v228_v9 }
 0x1ca   :  { %v466_v13 = vpop.f32.mrf.mxu1 }
 0x1cb   :  { %v318_v14 = vadd.f32 %v466_v13, %v434_v11  ;;  %v437_v13 = vld [vmem:[%s628_s10] ss:$0 sm:$0xff] }
 0x1cc   :  { %v312_v15 = vpop.f32.mrf.mxu1 }
 0x1cd   :  { %v322_v12 = vmax.f32 %v318_v14, 0.0  ;;  %v313_v16 = vadd.f32 %v434_v11, %v312_v15 }
 0x1cf   :  { %v349_v17 = vsel %vm325_vm2, %v322_v12, 0.0  ;;  %v321_v18 = vmax.f32 %v313_v16, 0.0 }
 0x1d0   :  { %v350_v19 = vrot.slane %v349_v17, 4 }
 0x1d1   :  { %v326_v20 = vsel %vm325_vm2, %v321_v18, 0.0 }
 0x1d2   :  { %v351_v21 = vadd.f32 %v350_v19, %v349_v17  ;;  %v327_v22 = vrot.slane %v326_v20, 4  ;;  %v438_v17 = vld [vmem:[#allocation2] ss:$0 sm:$0xff] }
 0x1d4   :  { %v352_v23 = vrot.slane %v351_v21, 2  ;;  %v328_v24 = vadd.f32 %v327_v22, %v326_v20 }
 0x1d6   :  { %v353_v25 = vadd.f32 %v352_v23, %v351_v21  ;;  %v329_v26 = vrot.slane %v328_v24, 2 }
 0x1d8   :  { %v354_v27 = vrot.slane %v353_v25, 1  ;;  %v330_v28 = vadd.f32 %v329_v26, %v328_v24 }
 0x1da   :  { %v355_v29 = vadd.f32 %v354_v27, %v353_v25  ;;  %v331_v30 = vrot.slane %v330_v28, 1 }
 0x1dc   :  { %v356_v31 = vmul.f32 0.125, %v355_v29  ;;  %v332_v32 = vadd.f32 %v331_v30, %v330_v28 }
 0x1de   :  { %v357_v33 = vsub.f32 %v322_v12, %v356_v31  ;;  %v333_v34 = vmul.f32 0.125, %v332_v32 }
 0x1e0   :  { %v358_v35 = vmul.f32 %v357_v33, %v357_v33  ;;  %v334_v36 = vsub.f32 %v321_v18, %v333_v34 }
 0x1e2   :  { %v359_v37 = vsel %vm325_vm2, %v358_v35, 0.0  ;;  %v335_v38 = vmul.f32 %v334_v36, %v334_v36 }
 0x1e3   :  { %v360_v39 = vrot.slane %v359_v37, 4 }
 0x1e4   :  { %v336_v40 = vsel %vm325_vm2, %v335_v38, 0.0 }
 0x1e5   :  { %v361_v41 = vadd.f32 %v360_v39, %v359_v37  ;;  %v337_v42 = vrot.slane %v336_v40, 4 }
 0x1e7   :  { %v362_v43 = vrot.slane %v361_v41, 2  ;;  %v338_v44 = vadd.f32 %v337_v42, %v336_v40 }
 0x1e9   :  { %v363_v45 = vadd.f32 %v362_v43, %v361_v41  ;;  %v339_v46 = vrot.slane %v338_v44, 2 }
 0x1eb   :  { %v364_v47 = vrot.slane %v363_v45, 1  ;;  %v340_v48 = vadd.f32 %v339_v46, %v338_v44 }
 0x1ed   :  { %v365_v49 = vadd.f32 %v364_v47, %v363_v45  ;;  %v341_v50 = vrot.slane %v340_v48, 1 }
 0x1ef   :  { %v366_v51 = vmul.f32 0.125, %v365_v49  ;;  %v342_v52 = vadd.f32 %v341_v50, %v340_v48 }
 0x1f1   :  { %v367_v53 = vadd.f32 1e-05, %v366_v51  ;;  %v343_v54 = vmul.f32 0.125, %v342_v52 }
 0x1f3   :  { %471 = vrsqrt.f32 %v367_v53  ;;  %v344_v55 = vadd.f32 1e-05, %v343_v54 }
 0x1f5   :  { %473 = vrsqrt.f32 %v344_v55 }
 0x200   :  { %v472_v57 = vpop.eup %471 }
 0x201   :  { %v369_v58 = vmul.f32 %v472_v57, %v323_v56 }
 0x202   :  { %v474_v60 = vpop.eup %473 }
 0x203   :  { %v370_v62 = vmul.f32 %v369_v58, %v356_v31  ;;  %v346_v63 = vmul.f32 %v474_v60, %v323_v56  ;;  %v382_v0 = vrot.slane %v369_v58, %v578_v59 }
 0x205   :  { %v347_v1 = vmul.f32 %v346_v63, %v333_v34  ;;  %v376_v2 = vrot.slane %v346_v63, %v578_v59  ;;  %v371_v3 = vsub.f32 %v324_v61, %v370_v62  ;;  %v401_v6 = vmul.f32 %v382_v0, %v322_v12 }
 0x207   :  { %v348_v4 = vsub.f32 %v324_v61, %v347_v1  ;;  %v396_v5 = vrot.slane %v371_v3, %v578_v59  ;;  %v400_v7 = vmul.f32 %v376_v2, %v321_v18 }
 0x209   :  { %v390_v8 = vrot.slane %v348_v4, %v578_v59  ;;  %v403_v10 = vadd.f32 %v401_v6, %v396_v5 }
 0x20b   :  { %v402_v9 = vadd.f32 %v400_v7, %v390_v8 }
 0x20d   :  { %v404_v11 = vsub.f32 %v402_v9, %v403_v10 }
 0x20f   :  { %v405_v14 = vmul.f32 %v404_v11, %v404_v11 }
 0x211   :  { %v413_v15 = vmul.f32 %v437_v13, %v405_v14 }
 0x213   :  { %v414_v16 = vsel %vm325_vm2, %v413_v15, 0.0 }
 0x214   :  { %415 = vadd.xlane.f32.xlu0 %v414_v16 }
 0x29d   :  { %v416_v19 = vpop.xlane.xlu0 %415 }
 0x29e   :  { %v424_v20 = vadd.f32 %v438_v17, %v416_v19 }
 0x2a0   :  { %426 = vst.msk [vmem:[%s629_s12] sm:$0xff] %vm425_vm3, %v424_v20 }

</bundles_post_ra>
